<compile_context>
chip_gen: v7x
topology: tpu7x:2x2x1
jax: 0.10.0
libtpu: 0.0.40
codegen_flags: <defaults>
</compile_context>

<pallas_src>
import functools

import jax
import jax.numpy as jnp
from jax.experimental import pallas as pl
from jax.experimental.pallas import tpu as pltpu


# --------------------------------------------------------------------------- kernel

def self_attention_kernel(x_ref, w_ref, b_ref, o_ref, *, exp_dtype):
    D = w_ref.shape[0]

    # Fused QKV projection on the MXU: (bB, D) @ (D, 3D) + (1, 3D) -> f32 accumulate.
    qkv = jnp.dot(x_ref[...], w_ref[...], preferred_element_type=jnp.float32) + b_ref[...]
    q = qkv[:, :D]                                                       # (bB, D)
    k = qkv[:, D:2 * D]                                                  # (bB, D)
    v = qkv[:, 2 * D:]                                                   # (bB, D)

    # Analytic row max of S[b, i, j] = q[b, i] * k[b, j] over j:
    #   max_j q*k = q * max_j(k) if q >= 0 else q * min_j(k)   (exactly the true max)
    # -> avoids a cross-lane max over the full (bB, D, D) tensor.
    k_max = jnp.max(k, axis=-1, keepdims=True)                           # (bB, 1)
    k_min = jnp.min(k, axis=-1, keepdims=True)                           # (bB, 1)
    s_max = jnp.where(q >= 0, q * k_max, q * k_min)                      # (bB, D)

    # Unnormalized softmax weights.  Scores and exp are fused into ONE expression so
    # only one (bB, D, D) temporary is live; exp runs in bf16 on bf16-EUP chips
    # (v6e / v7x), f32 elsewhere.  The s - s_max subtraction is always f32.
    p = jnp.exp((q[:, :, None] * k[:, None, :] - s_max[:, :, None]).astype(exp_dtype))
    pf = p.astype(jnp.float32)                                           # (bB, D, D)

    # Normalize AFTER the reduction: out = (sum_j p*v) / (sum_j p) == softmax(S) @ v.
    num = jnp.sum(pf * v[:, None, :], axis=-1)                           # (bB, D)
    den = jnp.sum(pf, axis=-1)                                           # (bB, D)
    out = num / den                                                      # exact divide

    # o_ref is either (bB, D) or the lane-dense (bB*D/128, 128) view of the same rows.
    o_ref[...] = out.reshape(o_ref.shape).astype(o_ref.dtype)


# --------------------------------------------------------------------------- wrapper

def _tpu_has_bf16_vector_units():
    """bf16 exp / bf16 MXU inputs only pay on v6e / v7x (v5e has no bf16 VPU/EUP)."""
    try:
        kind = jax.devices()[0].device_kind.lower()
    except Exception:
        return False
    return ("v6" in kind) or ("v7" in kind)


def _pick_block_b(B, D, *, max_block=512, temp_budget_bytes=8 << 20):
    """Largest batch tile that divides B, is a multiple of 8, keeps the ~3 live
    (block_b, D, D) f32 softmax temporaries under `temp_budget_bytes` (safe under
    every generation's scoped-VMEM default), and leaves >= 2 grid steps when the
    batch allows so v7x's two TensorCores both get work."""
    cap = temp_budget_bytes // (3 * D * D * 4)
    cap = min(max(8, (cap // 8) * 8), max_block)
    if B <= 8 or B % 8 != 0:
        return B
    best = 8
    for b in range(8, min(B, cap) + 1, 8):
        if B % b == 0:
            best = b
    if best == B and B >= 16 and (B // 2) % 8 == 0:
        best = B // 2                      # keep >= 2 parallel grid steps (v7x megacore)
    return best


def _pallas_attention_call(x_in, w_in, b_in, *, B, D, block_b, exp_dtype, lane_dense):
    kernel = functools.partial(self_attention_kernel, exp_dtype=exp_dtype)

    if lane_dense:
        # Row-major (B, D) viewed as (B*D/128, 128): free reshape in HBM, unmasked
        # full-lane stores in the kernel.
        out_shape = jax.ShapeDtypeStruct((B * D // 128, 128), jnp.float32)
        out_spec = pl.BlockSpec((block_b * D // 128, 128), lambda i: (i, 0))
    else:
        out_shape = jax.ShapeDtypeStruct((B, D), jnp.float32)
        out_spec = pl.BlockSpec((block_b, D), lambda i: (i, 0))

    return pl.pallas_call(
        kernel,
        out_shape=out_shape,
        grid_spec=pltpu.PrefetchScalarGridSpec(
            num_scalar_prefetch=0,
            grid=(B // block_b,),
            in_specs=[
                pl.BlockSpec((block_b, D), lambda i: (i, 0)),   # x: batch-blocked
                pl.BlockSpec((D, 3 * D), lambda i: (0, 0)),     # packed QKV weight (resident)
                pl.BlockSpec((1, 3 * D), lambda i: (0, 0)),     # packed QKV bias (resident)
            ],
            out_specs=out_spec,
        ),
        compiler_params=pltpu.CompilerParams(
            dimension_semantics=("parallel",),                  # batch steps shard across TCs
            vmem_limit_bytes=32 << 20,
        ),
    )(x_in, w_in, b_in)


def pack_qkv_params(wq, bq, wk, bk, wv, bv, dtype=jnp.float32):
    """One-time packing (hoisted out of the per-call hot path).

    wq/wk/wv: (D, D) in PyTorch (out, in) convention; bq/bk/bv: (D,).
    Returns W_qkv: (D, 3D) = [Wq^T | Wk^T | Wv^T], b_qkv: (1, 3D).
    """
    w_qkv = jnp.concatenate([wq.T, wk.T, wv.T], axis=1).astype(dtype)
    b_qkv = jnp.concatenate([bq, bk, bv]).reshape(1, -1).astype(dtype)
    return w_qkv, b_qkv


def self_attention(x, w_qkv, b_qkv, *, block_b=None, use_bf16=None):
    """x: (B, D); w_qkv: (D, 3D) pre-packed; b_qkv: (1, 3D) pre-packed."""
    B, D = x.shape
    assert w_qkv.shape == (D, 3 * D) and b_qkv.shape == (1, 3 * D)

    if use_bf16 is None:
        use_bf16 = _tpu_has_bf16_vector_units()
    if block_b is None:
        block_b = _pick_block_b(B, D)
    assert B % block_b == 0, "block_b must divide the batch size"

    in_dtype = jnp.bfloat16 if use_bf16 else jnp.float32
    exp_dtype = jnp.bfloat16 if use_bf16 else jnp.float32
    x_in = x.astype(in_dtype)
    w_in = w_qkv.astype(in_dtype)      # halves resident weight DMA/VMEM on bf16 chips
    b_in = b_qkv.astype(jnp.float32)   # bias is added to the f32 MXU accumulator

    lane_dense = (block_b * D) % 128 == 0
    call = functools.partial(_pallas_attention_call, x_in, w_in, b_in,
                             B=B, D=D, block_b=block_b, exp_dtype=exp_dtype)
    if lane_dense:
        try:
            out = call(lane_dense=True)
        except Exception:
            # In-kernel (block_b, D) -> (block_b*D/128, 128) relayout did not lower on
            # this toolchain; fall back to the masked-store layout (still correct).
            out = call(lane_dense=False)
    else:
        out = call(lane_dense=False)
    return out.reshape(B, D)


# --------------------------------------------------------------------------- reference

def self_attention_ref(x, wq, bq, wk, bk, wv, bv):
    """Pure-JAX reference mirroring the PyTorch forward."""
    q = x @ wq.T + bq
    k = x @ wk.T + bk
    v = x @ wv.T + bv
    s = q[:, :, None] * k[:, None, :]
    atten = jax.nn.softmax(s, axis=-1)
    return jnp.einsum("bij,bj->bi", atten, v)


# --------------------------------------------------------------------------- demo / test

if __name__ == "__main__":
    use_bf16 = _tpu_has_bf16_vector_units()
    # f32 path is near bit-parity with the reference; bf16 projection + bf16 exp
    # (v6e/v7x) carries ~1e-2-level relative error.
    tol = 1e-1 if use_bf16 else 2e-3

    def run_case(B, D, case_id):
        key = jax.random.fold_in(jax.random.PRNGKey(0), case_id)
        kx, kwq, kbq, kwk, kbk, kwv, kbv = jax.random.split(key, 7)

        # PyTorch Linear default init: U(-1/sqrt(in), 1/sqrt(in)).
        bound = 1.0 / jnp.sqrt(jnp.float32(D))
        x = jax.random.normal(kx, (B, D), dtype=jnp.float32)
        wq = jax.random.uniform(kwq, (D, D), jnp.float32, -bound, bound)
        bq = jax.random.uniform(kbq, (D,), jnp.float32, -bound, bound)
        wk = jax.random.uniform(kwk, (D, D), jnp.float32, -bound, bound)
        bk = jax.random.uniform(kbk, (D,), jnp.float32, -bound, bound)
        wv = jax.random.uniform(kwv, (D, D), jnp.float32, -bound, bound)
        bv = jax.random.uniform(kbv, (D,), jnp.float32, -bound, bound)

        # Pack parameters ONCE (hoisted out of the hot path).
        w_qkv, b_qkv = pack_qkv_params(wq, bq, wk, bk, wv, bv)

        out = self_attention(x, w_qkv, b_qkv)
        jax.block_until_ready(out)

        ref = self_attention_ref(x, wq, bq, wk, bk, wv, bv)
        assert out.shape == (B, D)
        err = float(jnp.max(jnp.abs(out - ref)))
        assert jnp.allclose(out, ref, atol=tol, rtol=tol), (
            f"Pallas output mismatch vs reference (B={B}, D={D}, max abs err={err})")

    # Module-native shape: batch_size=2, embed_dim=32 (single grid step, plain layout).
    run_case(B=2, D=32, case_id=0)
    # Larger batch exercising the big batch tile, the 2-step parallel grid (v7x
    # megacore) and the lane-dense output path.
    run_case(B=256, D=32, case_id=1)

    print("KERNEL_OK")
</pallas_src>

<mosaic_0001>
module attributes {stable_mosaic.version = 11 : i64} {
  func.func @self_attention_kernel(%arg0: i32, %arg1: memref<2x32xf32, #tpu.memory_space<vmem>>, %arg2: memref<32x96xf32, #tpu.memory_space<vmem>>, %arg3: memref<1x96xf32, #tpu.memory_space<vmem>>, %arg4: memref<2x32xf32, #tpu.memory_space<vmem>>) attributes {dimension_semantics = [#tpu.dimension_semantics<parallel>], iteration_bounds = array<i64: 1>, scalar_prefetch = 0 : i64, scratch_operands = 0 : i64, tpu.core_type = #tpu.core_type<tc>, window_params = [{transform_indices = @transform_0, window_bounds = array<i64: 2, 32>}, {pipeline_mode = #tpu.pipeline_mode<synchronous>, transform_indices = @transform_1, window_bounds = array<i64: 32, 96>}, {pipeline_mode = #tpu.pipeline_mode<synchronous>, transform_indices = @transform_2, window_bounds = array<i64: 1, 96>}, {transform_indices = @transform_3, window_bounds = array<i64: 2, 32>}]} {
    %c0 = arith.constant 0 : index
    %c0_0 = arith.constant 0 : index
    %0 = vector.load %arg1[%c0, %c0_0] : memref<2x32xf32, #tpu.memory_space<vmem>>, vector<2x32xf32>
    %c0_1 = arith.constant 0 : index
    %c0_2 = arith.constant 0 : index
    %1 = vector.load %arg2[%c0_1, %c0_2] : memref<32x96xf32, #tpu.memory_space<vmem>>, vector<32x96xf32>
    %cst = arith.constant dense<0.000000e+00> : vector<2x96xf32>
    %2 = tpu.matmul %0, %1, %cst {dimension_numbers = #tpu.dot_dimension_numbers<[1], [0], [0], [1], [0, 0, 1, 1], [], []>} : vector<2x32xf32>, vector<32x96xf32>, vector<2x96xf32> -> vector<2x96xf32>
    %c0_3 = arith.constant 0 : index
    %c0_4 = arith.constant 0 : index
    %3 = vector.load %arg3[%c0_3, %c0_4] : memref<1x96xf32, #tpu.memory_space<vmem>>, vector<1x96xf32>
    %4 = vector.broadcast %3 : vector<1x96xf32> to vector<2x96xf32>
    %5 = arith.addf %2, %4 : vector<2x96xf32>
    %6 = vector.extract_strided_slice %5 {offsets = [0, 0], sizes = [2, 32], strides = [1, 1]} : vector<2x96xf32> to vector<2x32xf32>
    %7 = vector.extract_strided_slice %5 {offsets = [0, 32], sizes = [2, 32], strides = [1, 1]} : vector<2x96xf32> to vector<2x32xf32>
    %8 = vector.extract_strided_slice %5 {offsets = [0, 64], sizes = [2, 32], strides = [1, 1]} : vector<2x96xf32> to vector<2x32xf32>
    %cst_5 = arith.constant dense<0xFF800000> : vector<2xf32>
    %9 = vector.multi_reduction <maximumf>, %7, %cst_5 [1] : vector<2x32xf32> to vector<2xf32>
    %10 = vector.shape_cast %9 : vector<2xf32> to vector<2x1xf32>
    %cst_6 = arith.constant dense<0x7F800000> : vector<2xf32>
    %11 = vector.multi_reduction <minimumf>, %7, %cst_6 [1] : vector<2x32xf32> to vector<2xf32>
    %12 = vector.shape_cast %11 : vector<2xf32> to vector<2x1xf32>
    %cst_7 = arith.constant 0.000000e+00 : f32
    %13 = vector.broadcast %cst_7 : f32 to vector<2x32xf32>
    %14 = arith.cmpf oge, %6, %13 : vector<2x32xf32>
    %15 = vector.broadcast %10 : vector<2x1xf32> to vector<2x32xf32>
    %16 = arith.mulf %6, %15 : vector<2x32xf32>
    %17 = vector.broadcast %12 : vector<2x1xf32> to vector<2x32xf32>
    %18 = arith.mulf %6, %17 : vector<2x32xf32>
    %19 = arith.select %14, %16, %18 : vector<2x32xi1>, vector<2x32xf32>
    %20 = vector.shape_cast %6 : vector<2x32xf32> to vector<2x32x1xf32>
    %21 = vector.shape_cast %7 : vector<2x32xf32> to vector<2x1x32xf32>
    %22 = vector.broadcast %20 : vector<2x32x1xf32> to vector<2x32x32xf32>
    %23 = vector.broadcast %21 : vector<2x1x32xf32> to vector<2x32x32xf32>
    %24 = arith.mulf %22, %23 : vector<2x32x32xf32>
    %25 = vector.shape_cast %19 : vector<2x32xf32> to vector<2x32x1xf32>
    %26 = vector.broadcast %25 : vector<2x32x1xf32> to vector<2x32x32xf32>
    %27 = arith.subf %24, %26 : vector<2x32x32xf32>
    %28 = math.exp %27 : vector<2x32x32xf32>
    %29 = vector.shape_cast %8 : vector<2x32xf32> to vector<2x1x32xf32>
    %30 = vector.broadcast %29 : vector<2x1x32xf32> to vector<2x32x32xf32>
    %31 = arith.mulf %28, %30 : vector<2x32x32xf32>
    %cst_8 = arith.constant dense<0.000000e+00> : vector<2x32xf32>
    %32 = vector.multi_reduction <add>, %31, %cst_8 [2] : vector<2x32x32xf32> to vector<2x32xf32>
    %cst_9 = arith.constant dense<0.000000e+00> : vector<2x32xf32>
    %33 = vector.multi_reduction <add>, %28, %cst_9 [2] : vector<2x32x32xf32> to vector<2x32xf32>
    %34 = arith.divf %32, %33 : vector<2x32xf32>
    %c0_10 = arith.constant 0 : index
    %c0_11 = arith.constant 0 : index
    %35 = vector.load %arg4[%c0_10, %c0_11] : memref<2x32xf32, #tpu.memory_space<vmem>>, vector<2x32xf32>
    tpu.vector_store %arg4[%c0_10, %c0_11], %34 {strides = array<i32>} : memref<2x32xf32, #tpu.memory_space<vmem>>, vector<2x32xf32>,
    return
  }
  func.func @transform_0(%arg0: i32) -> (i32, i32) {
    %c0_i32 = arith.constant 0 : i32
    %c0_i32_0 = arith.constant 0 : i32
    return %arg0, %c0_i32 : i32, i32
  }
  func.func @transform_1(%arg0: i32) -> (i32, i32) {
    %c0_i32 = arith.constant 0 : i32
    %c0_i32_0 = arith.constant 0 : i32
    %c0_i32_1 = arith.constant 0 : i32
    return %c0_i32, %c0_i32_0 : i32, i32
  }
  func.func @transform_2(%arg0: i32) -> (i32, i32) {
    %c0_i32 = arith.constant 0 : i32
    %c0_i32_0 = arith.constant 0 : i32
    %c0_i32_1 = arith.constant 0 : i32
    return %c0_i32, %c0_i32_0 : i32, i32
  }
  func.func @transform_3(%arg0: i32) -> (i32, i32) {
    %c0_i32 = arith.constant 0 : i32
    %c0_i32_0 = arith.constant 0 : i32
    return %arg0, %c0_i32 : i32, i32
  }
}

</mosaic_0001>

<bundles_post_ra>
// kernel: tpu_custom_call.1
= control target key start
LH: loop header
LB: loop body
LE: loop exit
PB: predicated region body
PF: predicated region fallthrough
CT: control target
= control target key end

     0   :  { %8 = vsyncpa [#allocation3], 0  ;;  %s756_s0 = inlined_call_operand.hbm [shape: f32[2,32], index: 0, kind: input, shape index: {}]   ;;  %s757_s1 = inlined_call_operand.hbm [shape: f32[32,96], index: 1, kind: input, shape index: {}]   ;;  %s758_s2 = inlined_call_operand.vmem [shape: f32[1,96], index: 2, kind: input, shape index: {}]   ;;  %s759_s3 = inlined_call_operand.hbm [shape: f32[2,32], index: 3, kind: output, shape index: {}]  }
   0x1   :  { %9 = vsyncpa [#allocation6], 0 }
   0x2   :  { %10 = vsyncpa [#allocation4], 0  ;;  %s634_s12 = smov [#allocation2]   ;;  %s635_s14 = smov [#allocation5]  }
   0x3   :  { %s17_s13 = sshll.u32 %s634_s12, 4  ;;  %s26_s15 = sshll.u32 %s635_s14, 4  ;;  %s18_s13 = int_to_ptr.vmem [resolvable:$true] %s17_s13  ;;  %s664_s15 = int_to_ptr.vmem [resolvable:$true] %s26_s15 }
   0x4   :  { %s562_s18 = scalar_lea.hbm %s756_s0, 32 }
   0x5   :  { %p563_p0 = scmp.ne.s32.totalorder %s756_s0, %s562_s18  ;;  %p566_p1 = scmp.lt.u32.totalorder %s562_s18, %s756_s0 }
   0x7   :  { %p568_p2 = pnand %p566_p1, %p563_p0 }
   0x9   :  { %571 = shalt.err (!%p568_p2)
}
   0xa   :  { %s572_s23 = scalar_lea.vmem %s18_s13, 32  ;;  %p577_p4 = scmp.lt.s32.totalorder %s18_s13, %s18_s13 }
   0xb   :  { %p573_p3 = scmp.ne.s32.totalorder %s18_s13, %s572_s23  ;;  %p578_p5 = scmp.lt.s32.totalorder %s572_s23, %s572_s23 }
   0xd   :  { %p579_p6 = por %p578_p5, %p577_p4 }
   0xf   :  { %p580_p7 = pnand %p579_p6, %p573_p3 }
  0x11   :  { %583 = shalt.err (!%p580_p7)
}
  0x12   :  { %20 = dma.hbm_to_vmem [thread:$0]  %s756_s0, 32, %s18_s13, [#allocation3]  }
  0x13   :  { %s584_s28 = scalar_lea.hbm %s757_s1, 512 }
  0x14   :  { %p585_p8 = scmp.ne.s32.totalorder %s757_s1, %s584_s28  ;;  %p588_p9 = scmp.lt.u32.totalorder %s584_s28, %s757_s1 }
  0x16   :  { %p590_p10 = pnand %p588_p9, %p585_p8 }
  0x18   :  { %593 = shalt.err (!%p590_p10)
}
  0x19   :  { %s594_s6 = scalar_lea.vmem %s664_s15, 512  ;;  %p599_p12 = scmp.lt.s32.totalorder %s664_s15, %s664_s15 }
  0x1a   :  { %p595_p11 = scmp.ne.s32.totalorder %s664_s15, %s594_s6  ;;  %p600_p13 = scmp.lt.s32.totalorder %s594_s6, %s594_s6 }
  0x1c   :  { %p601_p0 = por %p600_p13, %p599_p12 }
  0x1e   :  { %p602_p1 = pnand %p601_p0, %p595_p11 }
  0x20   :  { %605 = shalt.err (!%p602_p1)
}
  0x21   :  { %s636_s0 = smov 128   ;;  %s637_s7 = smov 8  }
  0x22   :  { %32 = dma.hbm_to_vmem [thread:$0]  %s757_s1, 512, %s664_s15, [#allocation6], %s636_s0, %s636_s0, %s637_s7  }
  0x23   :  { %628 = dma.done.wait [#allocation3], 32  }
  0x24   :  { %629 = vsyncadd [#allocation3], 4294967264 }
  0x25   :  { %630 = dma.done.wait [#allocation6], 512  }
  0x26   :  { %631 = vsyncadd [#allocation6], 4294966784  ;;  %v638_v0 = vmov 0.0|0.0   ;;  %vm639_vm0 = vmmov 0   ;;  %v640_v1 = vmov 0.0   ;;  %v42_v2 = vld [vmem:[#allocation5] sm:$0xff]  ;;  %v138_v9 = vlaneseq }
  0x27   :  { %514 = vmatprep.subr.bf16.mxu0 %v638_v0  ;;  %511 = vmatprep.mubr.msk.f32.mxu0 %vm639_vm0, %v640_v1  ;;  %v43_v3 = vld [vmem:[#allocation5 + $0x8] sm:$0xff]  ;;  %v44_v4 = vld [vmem:[#allocation5 + $0x10] sm:$0xff]  ;;  %v45_v6 = vld [vmem:[#allocation5 + $0x18] sm:$0xff]  ;;  %vm53_vm1 = vcmask 261120   ;;  %vm127_vm2 = vcmask 517376   ;;  %vm440_vm4 = vcmask 130112  }
  0x28   :  { %v515_v5 = vpack.c.bf16 %v43_v3, %v42_v2  ;;  %v518_v7 = vpack.c.bf16 %v45_v6, %v44_v4  ;;  %v41_v8 = vld [vmem:[#allocation2] sm:$0x3]  ;;  %v697_v10 = vshrl.u32 %v138_v9, 7  ;;  %v641_v21 = vmov 1966171168   ;;  %s643_s11 = smov [#allocation7]  }
  0x29   :  { %v496_v11 = vld [vmem:[%s758_s2] ss:$0 sm:$0xff]  ;;  %v178_v22 = vunpack.c.l.s4 %v641_v21  ;;  %s642_s2 = smov 96   ;;  %vm447_vm5 = vcmask 195712   ;;  %vm454_vm6 = vcmask 261312   ;;  %vm475_vm7 = vcmask 1041409  }
  0x2a   :  { %516 = vmatpush3.bf16.msra.mxu0 %v515_v5  ;;  %v140_v12 = vsub.s32 0, %v697_v10  ;;  %v159_v19 = vsub.s32 1, %v697_v10  ;;  %s486_s12 = sshll.u32 %s643_s11, 4  ;;  %vm478_vm8 = vcmask 254976   ;;  %s487_s12 = int_to_ptr.vmem [resolvable:$true] %s486_s12 }
  0x2b   :  { %517 = vmatprep.subr.bf16.mxu0 %v638_v0  ;;  %v179_v24 = vunpack.c.0.s8 %v178_v22  ;;  %s606_s13 = scalar_lea.vmem %s487_s12, 32  ;;  %p611_p3 = scmp.lt.s32.totalorder %s487_s12, %s487_s12 }
  0x2c   :  { %p607_p2 = scmp.ne.s32.totalorder %s487_s12, %s606_s13  ;;  %p612_p4 = scmp.lt.s32.totalorder %s606_s13, %s606_s13 }
  0x2d   :  { %v182_v29 = vsub.s32 %v179_v24, %v697_v10 }
  0x2e   :  { %519 = vmatpush3.bf16.msra.mxu0 %v518_v7  ;;  %p613_p5 = por %p612_p4, %p611_p3 }
  0x30   :  { %p614_p6 = pnand %p613_p5, %p607_p2 }
  0x31   :  { %512 = vmatmul.mubr.msk.f32.vlgmr.msra.gmra.mrb[0].mxu0 %vm53_vm1, %v41_v8 }
 0x104   :  { %v123_v13 = vpop.f32.mrb[0].mxu0 }
 0x105   :  { %v124_v14 = vadd.f32 %v496_v11, %v123_v13  ;;  %v513_v15 = vpop.f32.mrb[1].mxu0 }
 0x107   :  { %v128_v16 = vsel %vm127_vm2, %v124_v14, -inf  ;;  %v141_v17 = vrot.slane %v124_v14, %v140_v12  ;;  %v131_v18 = vsel %vm127_vm2, %v124_v14, inf  ;;  %v160_v20 = vrot.slane %v124_v14, %v159_v19 }
 0x108   :  { %129 = vmax.xlane.f32.xlu0 %v128_v16  ;;  %vm134_vm3 = vcmp.ge.f32.partialorder %v124_v14, 0.0  ;;  %v183_v31 = vrot.slane %v124_v14, %v182_v29 }
 0x109   :  { %143 = vbcast.lane.b32.xlu1 %v141_v17, 256 }
 0x10a   :  { %v184_v33 = vcombine.high %v183_v31, %v183_v31  ;;  %v191_v34 = vrot.slane %v183_v31, %v182_v29 }
 0x10c   :  { %132 = vmin.xlane.f32.xlu0 %v131_v18  ;;  %v198_v35 = vrot.slane %v184_v33, %v182_v29  ;;  %v202_v36 = vrot.slane %v191_v34, %v140_v12 }
 0x10d   :  { %147 = vbcast.lane.b32.xlu1 %v141_v17, 264 }
 0x10e   :  { %v206_v37 = vrot.slane %v198_v35, %v140_v12 }
 0x111   :  { %166 = vbcast.lane.b32.xlu1 %v160_v20, 264 }
 0x115   :  { %151 = vbcast.lane.b32.xlu1 %v141_v17, 272 }
 0x119   :  { %170 = vbcast.lane.b32.xlu1 %v160_v20, 272 }
 0x11d   :  { %155 = vbcast.lane.b32.xlu1 %v141_v17, 280 }
 0x121   :  { %174 = vbcast.lane.b32.xlu1 %v160_v20, 280 }
 0x122   :  { %162 = vbcast.lane.b32.xlu0 %v160_v20, 256 }
 0x17b   :  { %v144_v38 = vpop.permute.xlu1 %143 }
 0x17c   :  { %v209_v46 = vmul.f32 %v202_v36, %v144_v38 }
 0x17f   :  { %v148_v39 = vpop.permute.xlu1 %147 }
 0x180   :  { %v210_v47 = vmul.f32 %v202_v36, %v148_v39 }
 0x183   :  { %v167_v40 = vpop.permute.xlu1 %166 }
 0x184   :  { %v214_v52 = vmul.f32 %v206_v37, %v167_v40 }
 0x187   :  { %v152_v41 = vpop.permute.xlu1 %151 }
 0x188   :  { %v211_v60 = vmul.f32 %v202_v36, %v152_v41 }
 0x18b   :  { %v171_v42 = vpop.permute.xlu1 %170 }
 0x18c   :  { %v215_v61 = vmul.f32 %v206_v37, %v171_v42 }
 0x18f   :  { %v156_v43 = vpop.permute.xlu1 %155 }
 0x190   :  { %v212_v4 = vmul.f32 %v202_v36, %v156_v43 }
 0x193   :  { %v175_v44 = vpop.permute.xlu1 %174 }
 0x194   :  { %v216_v5 = vmul.f32 %v206_v37, %v175_v44 }
 0x195   :  { %v130_v23 = vpop.xlane.xlu0 %129 }
 0x196   :  { %v135_v26 = vmul.f32 %v130_v23, %v124_v14 }
 0x199   :  { %v133_v25 = vpop.xlane.xlu0 %132 }
 0x19a   :  { %v136_v27 = vmul.f32 %v133_v25, %v124_v14 }
 0x19c   :  { %v137_v28 = vsel %vm134_vm3, %v135_v26, %v136_v27 }
 0x19d   :  { %v220_v30 = vrot.slane %v137_v28, %v140_v12  ;;  %v239_v32 = vrot.slane %v137_v28, %v159_v19  ;;  %v163_v45 = vpop.permute.xlu0 %162 }
 0x19e   :  { %v213_v53 = vmul.f32 %v206_v37, %v163_v45 }
 0x19f   :  { %226 = vbcast.lane.b32.xlu0 %v220_v30, 264  ;;  %222 = vbcast.lane.b32.xlu1 %v220_v30, 256 }
 0x1a3   :  { %245 = vbcast.lane.b32.xlu0 %v239_v32, 264  ;;  %241 = vbcast.lane.b32.xlu1 %v239_v32, 256 }
 0x1a7   :  { %249 = vbcast.lane.b32.xlu0 %v239_v32, 272  ;;  %230 = vbcast.lane.b32.xlu1 %v220_v30, 272 }
 0x1ab   :  { %253 = vbcast.lane.b32.xlu0 %v239_v32, 280  ;;  %234 = vbcast.lane.b32.xlu1 %v220_v30, 280 }
 0x1af   :  { %281 = vrot.lane.b32.xlu0 %v206_v37, %s642_s2  ;;  %279 = vrot.lane.b32.xlu1 %v202_v36, %s642_s2 }
 0x211   :  { %v223_v48 = vpop.permute.xlu1 %222  ;;  %v227_v49 = vpop.permute.xlu0 %226 }
 0x212   :  { %v255_v50 = vsub.f32 %v209_v46, %v223_v48  ;;  %v256_v51 = vsub.f32 %v210_v47, %v227_v49 }
 0x214   :  { %v263_v54 = vmul.f32 1.442695, %v255_v50  ;;  %v265_v55 = vmul.f32 1.442695, %v256_v51 }
 0x215   :  { %v242_v56 = vpop.permute.xlu1 %241  ;;  %v246_v57 = vpop.permute.xlu0 %245 }
 0x216   :  { %530 = vpow2.f32 %v263_v54  ;;  %v259_v58 = vsub.f32 %v213_v53, %v242_v56  ;;  %v260_v59 = vsub.f32 %v214_v52, %v246_v57 }
 0x217   :  { %532 = vpow2.f32 %v265_v55 }
 0x218   :  { %v271_v62 = vmul.f32 1.442695, %v259_v58  ;;  %v273_v63 = vmul.f32 1.442695, %v260_v59 }
 0x219   :  { %v231_v0 = vpop.permute.xlu1 %230  ;;  %v250_v1 = vpop.permute.xlu0 %249 }
 0x21a   :  { %534 = vpow2.f32 %v271_v62  ;;  %v257_v2 = vsub.f32 %v211_v60, %v231_v0  ;;  %v261_v3 = vsub.f32 %v215_v61, %v250_v1 }
 0x21b   :  { %536 = vpow2.f32 %v273_v63 }
 0x21c   :  { %v267_v6 = vmul.f32 1.442695, %v257_v2  ;;  %v275_v7 = vmul.f32 1.442695, %v261_v3 }
 0x21d   :  { %v235_v8 = vpop.permute.xlu1 %234  ;;  %v254_v11 = vpop.permute.xlu0 %253 }
 0x21e   :  { %538 = vpow2.f32 %v267_v6  ;;  %v258_v12 = vsub.f32 %v212_v4, %v235_v8  ;;  %v262_v13 = vsub.f32 %v216_v5, %v254_v11 }
 0x21f   :  { %540 = vpow2.f32 %v275_v7 }
 0x220   :  { %v531_v14 = vpop.eup %530  ;;  %v269_v15 = vmul.f32 1.442695, %v258_v12  ;;  %v277_v16 = vmul.f32 1.442695, %v262_v13  ;;  %v430_v12 = vand.u32 127, %v138_v9 }
 0x221   :  { %v533_v17 = vpop.eup %532  ;;  %357 = vrot.lane.b32.xlu1 %v531_v14, %s642_s2  ;;  %v280_v23 = vpop.permute.xlu1 %279 }
 0x222   :  { %542 = vpow2.f32 %v269_v15  ;;  %359 = vrot.lane.b32.xlu0 %v533_v17, %s642_s2  ;;  %v285_v25 = vmul.f32 %v531_v14, %v280_v23  ;;  %v286_v26 = vmul.f32 %v533_v17, %v280_v23  ;;  %v282_v27 = vpop.permute.xlu0 %281  ;;  %v435_v15 = vadd.s32 4294967288, %v430_v12 }
 0x223   :  { %544 = vpow2.f32 %v277_v16 }
 0x224   :  { %v535_v18 = vpop.eup %534 }
 0x225   :  { %v537_v19 = vpop.eup %536  ;;  %365 = vrot.lane.b32.xlu1 %v535_v18, %s642_s2  ;;  %v289_v28 = vmul.f32 %v535_v18, %v282_v27 }
 0x226   :  { %367 = vrot.lane.b32.xlu0 %v537_v19, %s642_s2  ;;  %v290_v29 = vmul.f32 %v537_v19, %v282_v27 }
 0x228   :  { %v539_v20 = vpop.eup %538 }
 0x229   :  { %v541_v21 = vpop.eup %540  ;;  %361 = vrot.lane.b32.xlu1 %v539_v20, %s642_s2  ;;  %v287_v30 = vmul.f32 %v539_v20, %v280_v23  ;;  %v442_v20 = vadd.s32 4294967280, %v430_v12 }
 0x22a   :  { %369 = vrot.lane.b32.xlu0 %v541_v21, %s642_s2  ;;  %v291_v31 = vmul.f32 %v541_v21, %v282_v27 }
 0x22c   :  { %v543_v22 = vpop.eup %542 }
 0x22d   :  { %v545_v24 = vpop.eup %544  ;;  %363 = vrot.lane.b32.xlu1 %v543_v22, %s642_s2  ;;  %v288_v32 = vmul.f32 %v543_v22, %v280_v23  ;;  %v438_v23 = vsub.s32 %v435_v15, %v697_v10 }
 0x22e   :  { %371 = vrot.lane.b32.xlu0 %v545_v24, %s642_s2  ;;  %v292_v33 = vmul.f32 %v545_v24, %v282_v27  ;;  %v433_v24 = vsub.s32 %v430_v12, %v697_v10 }
 0x231   :  { %301 = vrot.lane.b32.xlu1 %v285_v25, %s642_s2  ;;  %v449_v25 = vadd.s32 4294967272, %v430_v12 }
 0x232   :  { %303 = vrot.lane.b32.xlu0 %v286_v26, %s642_s2 }
 0x235   :  { %309 = vrot.lane.b32.xlu1 %v289_v28, %s642_s2 }
 0x236   :  { %311 = vrot.lane.b32.xlu0 %v290_v29, %s642_s2 }
 0x239   :  { %305 = vrot.lane.b32.xlu1 %v287_v30, %s642_s2 }
 0x23a   :  { %313 = vrot.lane.b32.xlu0 %v291_v31, %s642_s2  ;;  %v445_v31 = vsub.s32 %v442_v20, %v697_v10 }
 0x23d   :  { %307 = vrot.lane.b32.xlu1 %v288_v32, %s642_s2 }
 0x23e   :  { %315 = vrot.lane.b32.xlu0 %v292_v33, %s642_s2 }
 0x293   :  { %v358_v34 = vpop.permute.xlu1 %357 }
 0x294   :  { %v360_v35 = vpop.permute.xlu0 %359  ;;  %v381_v36 = vsel %vm53_vm1, %v358_v34, 0.0 }
 0x295   :  { %382 = vadd.xlane.f32.xlu1 %v381_v36  ;;  %v384_v37 = vsel %vm53_vm1, %v360_v35, 0.0  ;;  %v452_v36 = vsub.s32 %v449_v25, %v697_v10 }
 0x296   :  { %385 = vadd.xlane.f32.xlu0 %v384_v37 }
 0x297   :  { %v366_v38 = vpop.permute.xlu1 %365 }
 0x298   :  { %v368_v39 = vpop.permute.xlu0 %367  ;;  %v393_v40 = vsel %vm53_vm1, %v366_v38, 0.0 }
 0x299   :  { %v396_v41 = vsel %vm53_vm1, %v368_v39, 0.0 }
 0x29a   :  { %394 = vadd.xlane.f32.xlu0 %v393_v40  ;;  %397 = vadd.xlane.f32.xlu1 %v396_v41 }
 0x29b   :  { %v362_v42 = vpop.permute.xlu1 %361 }
 0x29c   :  { %v370_v43 = vpop.permute.xlu0 %369  ;;  %v387_v44 = vsel %vm53_vm1, %v362_v42, 0.0 }
 0x29d   :  { %v399_v45 = vsel %vm53_vm1, %v370_v43, 0.0 }
 0x29e   :  { %388 = vadd.xlane.f32.xlu0 %v387_v44  ;;  %400 = vadd.xlane.f32.xlu1 %v399_v45 }
 0x29f   :  { %v364_v46 = vpop.permute.xlu1 %363 }
 0x2a0   :  { %v372_v47 = vpop.permute.xlu0 %371  ;;  %v390_v48 = vsel %vm53_vm1, %v364_v46, 0.0 }
 0x2a1   :  { %v402_v49 = vsel %vm53_vm1, %v372_v47, 0.0 }
 0x2a2   :  { %391 = vadd.xlane.f32.xlu0 %v390_v48  ;;  %403 = vadd.xlane.f32.xlu1 %v402_v49 }
 0x2a3   :  { %v302_v50 = vpop.permute.xlu1 %301 }
 0x2a4   :  { %v304_v51 = vpop.permute.xlu0 %303  ;;  %v325_v52 = vsel %vm53_vm1, %v302_v50, 0.0 }
 0x2a5   :  { %v328_v53 = vsel %vm53_vm1, %v304_v51, 0.0 }
 0x2a6   :  { %326 = vadd.xlane.f32.xlu0 %v325_v52  ;;  %329 = vadd.xlane.f32.xlu1 %v328_v53 }
 0x2a7   :  { %v310_v54 = vpop.permute.xlu1 %309 }
 0x2a8   :  { %v312_v55 = vpop.permute.xlu0 %311  ;;  %v337_v56 = vsel %vm53_vm1, %v310_v54, 0.0 }
 0x2a9   :  { %v340_v57 = vsel %vm53_vm1, %v312_v55, 0.0 }
 0x2aa   :  { %338 = vadd.xlane.f32.xlu0 %v337_v56  ;;  %341 = vadd.xlane.f32.xlu1 %v340_v57 }
 0x2ab   :  { %v306_v58 = vpop.permute.xlu1 %305 }
 0x2ac   :  { %v314_v59 = vpop.permute.xlu0 %313  ;;  %v331_v60 = vsel %vm53_vm1, %v306_v58, 0.0 }
 0x2ad   :  { %v343_v61 = vsel %vm53_vm1, %v314_v59, 0.0 }
 0x2ae   :  { %332 = vadd.xlane.f32.xlu0 %v331_v60  ;;  %344 = vadd.xlane.f32.xlu1 %v343_v61 }
 0x2af   :  { %v308_v62 = vpop.permute.xlu1 %307 }
 0x2b0   :  { %v316_v63 = vpop.permute.xlu0 %315  ;;  %v334_v0 = vsel %vm53_vm1, %v308_v62, 0.0 }
 0x2b1   :  { %v346_v1 = vsel %vm53_vm1, %v316_v63, 0.0 }
 0x2b2   :  { %335 = vadd.xlane.f32.xlu0 %v334_v0  ;;  %347 = vadd.xlane.f32.xlu1 %v346_v1 }
 0x322   :  { %v383_v2 = vpop.xlane.xlu1 %382 }
 0x323   :  { %v386_v3 = vpop.xlane.xlu0 %385  ;;  %546 = vrcp.f32 %v383_v2 }
 0x324   :  { %548 = vrcp.f32 %v386_v3 }
 0x327   :  { %v398_v4 = vpop.xlane.xlu1 %397  ;;  %v395_v5 = vpop.xlane.xlu0 %394 }
 0x328   :  { %550 = vrcp.f32 %v398_v4 }
 0x329   :  { %552 = vrcp.f32 %v395_v5 }
 0x32b   :  { %v401_v6 = vpop.xlane.xlu1 %400  ;;  %v389_v7 = vpop.xlane.xlu0 %388 }
 0x32c   :  { %554 = vrcp.f32 %v401_v6 }
 0x32d   :  { %556 = vrcp.f32 %v389_v7  ;;  %v547_v16 = vpop.eup %546 }
 0x32e   :  { %v549_v17 = vpop.eup %548 }
 0x32f   :  { %v404_v8 = vpop.xlane.xlu1 %403  ;;  %v392_v11 = vpop.xlane.xlu0 %391 }
 0x330   :  { %558 = vrcp.f32 %v404_v8 }
 0x331   :  { %560 = vrcp.f32 %v392_v11 }
 0x332   :  { %v551_v21 = vpop.eup %550 }
 0x333   :  { %v330_v13 = vpop.xlane.xlu1 %329  ;;  %v327_v14 = vpop.xlane.xlu0 %326 }
 0x334   :  { %v553_v22 = vpop.eup %552  ;;  %v408_v27 = vmul.f32 %v549_v17, %v330_v13  ;;  %v406_v9 = vmul.f32 %v547_v16, %v327_v14 }
 0x336   :  { %v555_v26 = vpop.eup %554  ;;  %v439_v38 = vrot.slane %v408_v27, %v438_v23  ;;  %v434_v39 = vrot.slane %v406_v9, %v433_v24 }
 0x337   :  { %v342_v18 = vpop.xlane.xlu1 %341  ;;  %v339_v19 = vpop.xlane.xlu0 %338 }
 0x338   :  { %v416_v28 = vmul.f32 %v551_v21, %v342_v18  ;;  %v414_v29 = vmul.f32 %v553_v22, %v339_v19  ;;  %v557_v30 = vpop.eup %556  ;;  %v441_v49 = vsel %vm440_vm4, %v439_v38, %v434_v39 }
 0x33a   :  { %v559_v37 = vpop.eup %558  ;;  %v463_v40 = vrot.slane %v416_v28, %v438_v23  ;;  %v459_v41 = vrot.slane %v414_v29, %v433_v24 }
 0x33b   :  { %v345_v32 = vpop.xlane.xlu1 %344  ;;  %v333_v33 = vpop.xlane.xlu0 %332 }
 0x33c   :  { %v418_v34 = vmul.f32 %v555_v26, %v345_v32  ;;  %v410_v35 = vmul.f32 %v557_v30, %v333_v33  ;;  %v561_v42 = vpop.eup %560  ;;  %v464_v10 = vsel %vm440_vm4, %v463_v40, %v459_v41 }
 0x33e   :  { %v468_v43 = vrot.slane %v418_v34, %v445_v31  ;;  %v446_v44 = vrot.slane %v410_v35, %v445_v31 }
 0x33f   :  { %v348_v45 = vpop.xlane.xlu1 %347  ;;  %v336_v46 = vpop.xlane.xlu0 %335 }
 0x340   :  { %v420_v47 = vmul.f32 %v559_v37, %v348_v45  ;;  %v412_v48 = vmul.f32 %v561_v42, %v336_v46  ;;  %v469_v52 = vsel %vm447_vm5, %v468_v43, %v464_v10  ;;  %v448_v53 = vsel %vm447_vm5, %v446_v44, %v441_v49 }
 0x342   :  { %v473_v50 = vrot.slane %v420_v47, %v452_v36  ;;  %v453_v51 = vrot.slane %v412_v48, %v452_v36 }
 0x344   :  { %v455_v54 = vsel %vm454_vm6, %v453_v51, %v448_v53  ;;  %v474_v55 = vsel %vm454_vm6, %v473_v50, %v469_v52 }
 0x345   :  { %v476_v56 = vsel %vm475_vm7, %v474_v55, %v455_v54 }
 0x346   :  { %479 = vst.msk [vmem:[#allocation7] sm:$0x3] %vm478_vm8, %v476_v56 }
 0x347   :  { %617 = shalt.err (!%p614_p6)
}
 0x348   :  { %s618_s16 = scalar_lea.hbm %s759_s3, 32 }
 0x349   :  { %p619_p7 = scmp.ne.s32.totalorder %s759_s3, %s618_s16  ;;  %p622_p8 = scmp.lt.u32.totalorder %s618_s16, %s759_s3 }
 0x34b   :  { %p624_p9 = pnand %p622_p8, %p619_p7 }
 0x34d   :  { %627 = shalt.err (!%p624_p9)
}
 0x34e   :  { %489 = dma.vmem_to_hbm [thread:$0]  %s487_s12, 32, %s759_s3, [#allocation4]  }
 0x34f   :  { %632 = dma.done.wait [#allocation4], 32  }
 0x350   :  { %633 = vsyncadd [#allocation4], 4294967264 }
 0x351   :  { %493 = vsyncpa [#allocation3], 1 }
 0x352   :  { %494 = vsyncpa [#allocation6], 1 }
 0x353   :  { %495 = vsyncpa [#allocation4], 1 }

</bundles_post_ra>
